<compile_context>
chip_gen: v7x
topology: tpu7x:2x2x1
jax: 0.10.0
libtpu: 0.0.40
codegen_flags: <defaults>
</compile_context>

<pallas_src>
import jax
import jax.numpy as jnp
from jax.experimental import pallas as pl
from jax.experimental.pallas import tpu as pltpu


def _conv2d_same_kernel(x_ref, w_ref, b_ref, o_ref):
    # x_ref: (K2C, T)    im2col block, T lanes (multiple of 128)
    # w_ref: (Cout, K2C) reshaped conv weights
    # b_ref: (Cout, 1)   f32 bias (broadcasts over the lane dim)
    # o_ref: (Cout, T)   lane-dense output block
    acc = jnp.dot(w_ref[...], x_ref[...], preferred_element_type=jnp.float32)
    o_ref[...] = (acc + b_ref[...]).astype(o_ref.dtype)


def _round_up(x, m):
    return (x + m - 1) // m * m


def conv2d_same(x_nchw, weight_oihw, bias, kernel_size, *,
                compute_dtype=jnp.bfloat16, lane_tile=4096):
    """Equivalent of Conv2dSame.forward: ReflectionPad2d((ka,kb,ka,kb)) + Conv2d."""
    ka = kernel_size // 2
    kb = ka - 1 if kernel_size % 2 == 0 else ka

    N, Cin, H, W = x_nchw.shape
    Cout = weight_oihw.shape[0]
    KH = KW = kernel_size
    HW = H * W
    NHW = N * HW
    K2C = KH * KW * Cin
    out_dtype = x_nchw.dtype

    # jnp.pad 'reflect' (== PyTorch ReflectionPad2d) requires pad < dim size.
    assert max(ka, kb) < H and max(ka, kb) < W, "reflection pad >= input size"

    # Reflection pad: (left, right, top, bottom) = (ka, kb, ka, kb); NCHW kept.
    x_pad = jnp.pad(x_nchw, ((0, 0), (0, 0), (ka, kb), (ka, kb)), mode="reflect")

    # im2col with the batch folded into the lane dim, by pure indexing:
    #   x_col[(kh*KW + kw)*Cin + ci, n*HW + h*W + w] = x_pad[n, ci, h+kh, w+kw]
    # transpose / slices / stack / reshape / convert are all XLA-fusible; with
    # allow_input_fusion below this never has to round-trip HBM as a 9x tensor.
    x_pad_t = jnp.transpose(x_pad, (1, 0, 2, 3))              # (Cin, N, Hp, Wp)
    taps = [x_pad_t[:, :, kh:kh + H, kw:kw + W]               # (Cin, N, H, W)
            for kh in range(KH) for kw in range(KW)]
    x_col = (jnp.stack(taps, axis=0)                          # (KH*KW, Cin, N, H, W)
             .reshape(K2C, NHW)
             .astype(compute_dtype))

    # OIHW -> (Cout, KH, KW, Cin) -> (Cout, K2C); row order matches x_col.
    w2 = (jnp.transpose(weight_oihw, (0, 2, 3, 1))
          .reshape(Cout, K2C)
          .astype(compute_dtype))
    b2 = bias.reshape(Cout, 1).astype(jnp.float32)

    # Lane tiling: keep the minor dim a multiple of 128 (full unmasked vst);
    # only tile when it outgrows `lane_tile` (bounds double-buffered VMEM).
    tile = min(_round_up(NHW, 128), _round_up(lane_tile, 128))
    nhw_pad = _round_up(NHW, tile)
    if nhw_pad != NHW:
        x_col = jnp.pad(x_col, ((0, 0), (0, nhw_pad - NHW)))
    num_tiles = nhw_pad // tile

    out_flat = pl.pallas_call(
        _conv2d_same_kernel,
        out_shape=jax.ShapeDtypeStruct((Cout, nhw_pad), out_dtype),
        grid=(num_tiles,),
        in_specs=[
            pl.BlockSpec((K2C, tile), lambda t: (0, t)),
            pl.BlockSpec((Cout, K2C), lambda t: (0, 0)),
            pl.BlockSpec((Cout, 1), lambda t: (0, 0)),
        ],
        out_specs=pl.BlockSpec((Cout, tile), lambda t: (0, t)),
        compiler_params=pltpu.CompilerParams(
            dimension_semantics=("parallel",),
            # Let XLA fuse the reflect-pad + im2col producer into operand 0
            # instead of materializing x_col (KH*KW x the raw image) in HBM.
            allow_input_fusion=[True, False, False],
        ),
    )(x_col, w2, b2)

    # (Cout, N*H*W) -> (N, Cout, H, W); the trailing 16 KiB-scale transpose is
    # negligible and keeps the kernel's lane-dense output layout intact.
    out = out_flat[:, :NHW].reshape(Cout, N, H, W)
    return jnp.transpose(out, (1, 0, 2, 3))


if __name__ == "__main__":
    # Module configuration: Conv2dSame(in_channels=4, out_channels=8, kernel_size=3)
    in_channels, out_channels, kernel_size = 4, 8, 3
    batch, H, W = 2, 16, 16

    key = jax.random.PRNGKey(0)
    k_x, k_w, k_b = jax.random.split(key, 3)

    x = jax.random.normal(k_x, (batch, in_channels, H, W), dtype=jnp.float32)
    # PyTorch Conv2d weight layout is OIHW.
    weight = jax.random.normal(
        k_w, (out_channels, in_channels, kernel_size, kernel_size),
        dtype=jnp.float32) * 0.1
    bias = jax.random.normal(k_b, (out_channels,), dtype=jnp.float32) * 0.1

    conv_bf16 = jax.jit(lambda a, w, b: conv2d_same(a, w, b, kernel_size))
    conv_f32 = jax.jit(lambda a, w, b: conv2d_same(
        a, w, b, kernel_size, compute_dtype=jnp.float32))

    out = jax.block_until_ready(conv_bf16(x, weight, bias))
    out_f32 = jax.block_until_ready(conv_f32(x, weight, bias))

    # Reference: same reflection padding + VALID conv via XLA.
    ka = kernel_size // 2
    kb_ = ka - 1 if kernel_size % 2 == 0 else ka
    x_pad_ref = jnp.pad(x, ((0, 0), (0, 0), (ka, kb_), (ka, kb_)), mode="reflect")
    ref = jax.lax.conv_general_dilated(
        x_pad_ref, weight, window_strides=(1, 1), padding="VALID",
        dimension_numbers=("NCHW", "OIHW", "NCHW"),
    ) + bias[None, :, None, None]

    assert out.shape == (batch, out_channels, H, W), out.shape
    # f32-operand path: tight tolerance.
    assert jnp.allclose(out_f32, ref, atol=1e-4, rtol=1e-4), float(
        jnp.max(jnp.abs(out_f32 - ref)))
    # Default bf16-operand path (f32 accumulation): looser tolerance.
    assert jnp.allclose(out, ref, atol=5e-2, rtol=5e-2), float(
        jnp.max(jnp.abs(out - ref)))

    print("KERNEL_OK")
</pallas_src>

<mosaic_0001>
module attributes {stable_mosaic.version = 11 : i64} {
  func.func @_conv2d_same_kernel(%arg0: i32, %arg1: memref<36x512xbf16, #tpu.memory_space<vmem>>, %arg2: memref<8x36xbf16, #tpu.memory_space<vmem>>, %arg3: memref<8x1xf32, #tpu.memory_space<vmem>>, %arg4: memref<8x512xf32, #tpu.memory_space<vmem>>) attributes {dimension_semantics = [#tpu.dimension_semantics<parallel>], iteration_bounds = array<i64: 1>, scalar_prefetch = 0 : i64, scratch_operands = 0 : i64, tpu.core_type = #tpu.core_type<tc>, window_params = [{transform_indices = @transform_0, window_bounds = array<i64: 36, 512>}, {pipeline_mode = #tpu.pipeline_mode<synchronous>, transform_indices = @transform_1, window_bounds = array<i64: 8, 36>}, {pipeline_mode = #tpu.pipeline_mode<synchronous>, transform_indices = @transform_2, window_bounds = array<i64: 8, 1>}, {transform_indices = @transform_3, window_bounds = array<i64: 8, 512>}]} {
    %c0 = arith.constant 0 : index
    %c0_0 = arith.constant 0 : index
    %0 = vector.load %arg2[%c0, %c0_0] : memref<8x36xbf16, #tpu.memory_space<vmem>>, vector<8x36xbf16>
    %c0_1 = arith.constant 0 : index
    %c0_2 = arith.constant 0 : index
    %1 = vector.load %arg1[%c0_1, %c0_2] : memref<36x512xbf16, #tpu.memory_space<vmem>>, vector<36x512xbf16>
    %cst = arith.constant dense<0.000000e+00> : vector<8x512xf32>
    %2 = tpu.matmul %0, %1, %cst {dimension_numbers = #tpu.dot_dimension_numbers<[1], [0], [0], [1], [0, 0, 1, 1], [], []>} : vector<8x36xbf16>, vector<36x512xbf16>, vector<8x512xf32> -> vector<8x512xf32>
    %c0_3 = arith.constant 0 : index
    %c0_4 = arith.constant 0 : index
    %3 = vector.load %arg3[%c0_3, %c0_4] : memref<8x1xf32, #tpu.memory_space<vmem>>, vector<8x1xf32>
    %4 = vector.broadcast %3 : vector<8x1xf32> to vector<8x512xf32>
    %5 = arith.addf %2, %4 : vector<8x512xf32>
    %c0_5 = arith.constant 0 : index
    %c0_6 = arith.constant 0 : index
    %6 = vector.load %arg4[%c0_5, %c0_6] : memref<8x512xf32, #tpu.memory_space<vmem>>, vector<8x512xf32>
    tpu.vector_store %arg4[%c0_5, %c0_6], %5 {strides = array<i32>} : memref<8x512xf32, #tpu.memory_space<vmem>>, vector<8x512xf32>,
    return
  }
  func.func @transform_0(%arg0: i32) -> (i32, i32) {
    %c0_i32 = arith.constant 0 : i32
    %c0_i32_0 = arith.constant 0 : i32
    return %c0_i32, %arg0 : i32, i32
  }
  func.func @transform_1(%arg0: i32) -> (i32, i32) {
    %c0_i32 = arith.constant 0 : i32
    %c0_i32_0 = arith.constant 0 : i32
    %c0_i32_1 = arith.constant 0 : i32
    return %c0_i32, %c0_i32_0 : i32, i32
  }
  func.func @transform_2(%arg0: i32) -> (i32, i32) {
    %c0_i32 = arith.constant 0 : i32
    %c0_i32_0 = arith.constant 0 : i32
    %c0_i32_1 = arith.constant 0 : i32
    return %c0_i32, %c0_i32_0 : i32, i32
  }
  func.func @transform_3(%arg0: i32) -> (i32, i32) {
    %c0_i32 = arith.constant 0 : i32
    %c0_i32_0 = arith.constant 0 : i32
    return %c0_i32, %arg0 : i32, i32
  }
}

</mosaic_0001>

<bundles_post_ra>
// kernel: _lambda_.1
= control target key start
LH: loop header
LB: loop body
LE: loop exit
PB: predicated region body
PF: predicated region fallthrough
CT: control target
= control target key end

     0   :  { %v223_v1 = vmov 0   ;;  %vm86_vm0 = vcmask 1041408   ;;  %vm82_vm1 = vcmask 293888   ;;  %s296_s0 = inlined_call_operand.vmem [shape: bf16[36,512], index: 0, kind: input, shape index: {}]   ;;  %s297_s2 = inlined_call_operand.vmem [shape: f32[8,1], index: 2, kind: input, shape index: {}]   ;;  %s298_s1 = inlined_call_operand.vmem [shape: bf16[8,36], index: 1, kind: input, shape index: {}]   ;;  %s299_s3 = inlined_call_operand.vmem [shape: f32[8,512], index: 3, kind: output, shape index: {}]  }
   0x1   :  { %v207_v0 = vld [vmem:[%s296_s0 + $0x4] ss:$16 sps:$4 sm:$0xff]   ;;  %131 = vmatprep.mubr.bf16.mxu0 %v223_v1  ;;  %172 = vmatprep.mubr.bf16.mxu1 %v223_v1  ;;  %v209_v2 = vld [vmem:[%s296_s0 + $0xc] ss:$16 sps:$4 sm:$0xff]   ;;  %v211_v3 = vld [vmem:[%s296_s0] ss:$16 sps:$4 sm:$0xff]  }
   0x2   :  { %206 = vset.pattern.permute.xlu0 %v223_v1  ;;  %99 = vmatprep.subr.bf16.mxu0 %v207_v0  ;;  %v212_v4 = vld [vmem:[%s296_s0 + $0x8] ss:$16 sps:$4 sm:$0xff]   ;;  %v213_v5 = vld [vmem:[%s296_s0 + $0x24] ss:$16 sps:$4 sm:$0xff]   ;;  %v215_v6 = vld [vmem:[%s296_s0 + $0x2c] ss:$16 sps:$4 sm:$0xff]  }
   0x3   :  { %140 = vmatprep.subr.bf16.mxu1 %v209_v2  ;;  %100 = vmatpush1.bf16.msra.mxu0 %v211_v3  ;;  %v217_v7 = vld [vmem:[%s296_s0 + $0x20] ss:$16 sps:$4 sm:$0xff]   ;;  %v218_v8 = vld [vmem:[%s296_s0 + $0x28] ss:$16 sps:$4 sm:$0xff]  }
   0x4   :  { %141 = vmatpush1.bf16.msra.mxu1 %v212_v4  ;;  %101 = vmatprep.subr.bf16.mxu0 %v213_v5  ;;  %v24_v9 = vld [vmem:[%s296_s0 + $0x40] sm:$0x33]  ;;  %v25_v10 = vld [vmem:[%s296_s0 + $0x48] sm:$0x33] }
   0x5   :  { %142 = vmatprep.subr.bf16.mxu1 %v215_v6  ;;  %v198_v11 = vcombine.high %v24_v9, %v24_v9  ;;  %v200_v12 = vcombine.high %v25_v10, %v25_v10  ;;  %v197_v13 = vcombine.low %v24_v9, %v24_v9  ;;  %v199_v14 = vcombine.low %v25_v10, %v25_v10  ;;  %v26_v15 = vld [vmem:[%s297_s2] sm:$0xff] }
   0x6   :  { %29 = vperm.xlu0 %206, %v26_v15   ;;  %v15_v18 = vld [vmem:[%s298_s1] sm:$0xf] }
   0x7   :  { %102 = vmatpush1.bf16.msra.mxu0 %v217_v7  ;;  %v88_v16 = vsel %vm86_vm0, %v197_v13, 0  ;;  %v94_v17 = vsel %vm86_vm0, %v199_v14, 0 }
   0x8   :  { %143 = vmatpush1.bf16.msra.mxu1 %v218_v8  ;;  %201 = vmatprep.subr.msk.bf16.mxu0 %vm86_vm0, %v198_v11 }
   0x9   :  { %203 = vmatprep.subr.msk.bf16.mxu1 %vm86_vm0, %v200_v12 }
   0xb   :  { %104 = vmatpush1.bf16.msra.mxu0 %v88_v16 }
   0xc   :  { %145 = vmatpush1.bf16.msra.mxu1 %v94_v17 }
   0xe   :  { %202 = vmatmul.mubr.msk.bf16.vlgmr.msra.gmra.mrb[0].mxu0 %vm82_vm1, %v15_v18 }
   0xf   :  { %204 = vmatmul.mubr.msk.bf16.vlgmr.msra.gmra.mrb[0].mxu1 %vm82_vm1, %v15_v18 }
  0x85   :  { %v30_v19 = vpop.permute.xlu0 %29 }
  0xe1   :  { %v133_v20 = vpop.f32.mrb[0].mxu0 }
  0xe2   :  { %v174_v21 = vpop.f32.mrb[0].mxu1  ;;  %v134_v22 = vadd.f32 %v133_v20, %v30_v19  ;;  %v135_v24 = vpop.f32.mrb[1].mxu0 }
  0xe3   :  { %v175_v23 = vadd.f32 %v174_v21, %v30_v19  ;;  %v176_v25 = vpop.f32.mrb[1].mxu1  ;;  %v136_v26 = vadd.f32 %v135_v24, %v30_v19  ;;  %v137_v28 = vpop.f32.mrb[2].mxu0 }
  0xe4   :  { %v177_v27 = vadd.f32 %v176_v25, %v30_v19  ;;  %v178_v29 = vpop.f32.mrb[2].mxu1  ;;  %181 = vst [vmem:[%s299_s3] sm:$0xff] %v134_v22  ;;  %v138_v30 = vpop.f32.mrb[3].mxu0 }
  0xe5   :  { %183 = vst [vmem:[%s299_s3 + $0x10] sm:$0xff] %v175_v23  ;;  %v179_v31 = vpop.f32.mrb[3].mxu1  ;;  %182 = vst [vmem:[%s299_s3 + $0x8] sm:$0xff] %v136_v26 }
  0xe6   :  { %184 = vst [vmem:[%s299_s3 + $0x18] sm:$0xff] %v177_v27 }

</bundles_post_ra>
